<compile_context>
chip_gen: v6e
topology: v6e:2x2x1
jax: 0.10.0
libtpu: 0.0.40
codegen_flags: <defaults>
</compile_context>

<pallas_src>
import functools

import jax
import jax.numpy as jnp
from jax import lax
from jax.experimental import pallas as pl
from jax.experimental.pallas import tpu as pltpu

EPS = 1e-12                         # matches torch.nn.functional.normalize default
_LANE = 128
_TARGET_BLOCK_BYTES = 4 * 1024 * 1024   # per input block; x4 live buffers stays well under VMEM


def _l2norm_kernel(x_ref, o_ref):
    # Block: (1, C, TILE_HW). Each lane column holds one spatial position's
    # channel vector; normalize along the C (sublane) axis.
    x = x_ref[...].astype(jnp.float32)
    sumsq = jnp.sum(x * x, axis=-2, keepdims=True)        # (1, 1, TILE_HW)
    inv = jnp.minimum(lax.rsqrt(sumsq), 1.0 / EPS)        # == x / max(||x||, eps)
    o_ref[...] = (x * inv).astype(o_ref.dtype)


@functools.partial(jax.jit, static_argnames=("dim",))
def l2norm(x, dim=1):
    """F.normalize(x, p=2, dim=dim) for a 4-D NCHW tensor (dim=1 is the hot path)."""
    assert x.ndim == 4 and dim == 1, "this kernel implements the NCHW / dim=1 case"
    B, C, H, W = x.shape
    HW = H * W

    # Free view (no data movement): channel axis stays put, H*W becomes the lane axis.
    x3 = x.reshape(B, C, HW)

    itemsize = jnp.dtype(x.dtype).itemsize
    max_tile = max(_LANE, (_TARGET_BLOCK_BYTES // max(1, C * itemsize)) // _LANE * _LANE)
    if HW % _LANE == 0:
        tile_hw = min(max_tile, HW)
    elif HW <= max_tile:
        tile_hw = HW                  # full lane dim (allowed when equal to the array dim)
    else:
        tile_hw = max_tile            # partial trailing block; OOB lanes are masked on store
    grid = (B, pl.cdiv(HW, tile_hw))

    out3 = pl.pallas_call(
        _l2norm_kernel,
        out_shape=jax.ShapeDtypeStruct((B, C, HW), x.dtype),
        grid_spec=pltpu.PrefetchScalarGridSpec(
            num_scalar_prefetch=0,
            grid=grid,
            in_specs=[pl.BlockSpec((1, C, tile_hw), lambda b, j: (b, 0, j))],
            out_specs=pl.BlockSpec((1, C, tile_hw), lambda b, j: (b, 0, j)),
        ),
        compiler_params=pltpu.CompilerParams(
            dimension_semantics=("parallel", "parallel"),
            vmem_limit_bytes=48 * 1024 * 1024,
        ),
    )(x3)

    return out3.reshape(B, C, H, W)


if __name__ == "__main__":
    key = jax.random.PRNGKey(0)
    x = jax.random.normal(key, (2, 4, 16, 16), dtype=jnp.float32)

    out = l2norm(x, dim=1)
    jax.block_until_ready(out)

    # Reference check in plain JAX (same semantics as F.normalize).
    norm = jnp.sqrt(jnp.sum(x * x, axis=1, keepdims=True))
    ref = x / jnp.maximum(norm, EPS)
    assert out.shape == x.shape and out.dtype == x.dtype
    assert jnp.max(jnp.abs(out - ref)) < 1e-5

    print("KERNEL_OK")
</pallas_src>

<mosaic_0001>
module attributes {stable_mosaic.version = 11 : i64} {
  func.func @_l2norm_kernel(%arg0: i32, %arg1: i32, %arg2: memref<1x4x256xf32, #tpu.memory_space<vmem>>, %arg3: memref<1x4x256xf32, #tpu.memory_space<vmem>>) attributes {dimension_semantics = [#tpu.dimension_semantics<parallel>, #tpu.dimension_semantics<parallel>], iteration_bounds = array<i64: 2, 1>, scalar_prefetch = 0 : i64, scratch_operands = 0 : i64, tpu.core_type = #tpu.core_type<tc>, window_params = [{transform_indices = @transform_0, window_bounds = array<i64: 1, 4, 256>}, {transform_indices = @transform_1, window_bounds = array<i64: 1, 4, 256>}]} {
    %c0 = arith.constant 0 : index
    %c0_0 = arith.constant 0 : index
    %c0_1 = arith.constant 0 : index
    %0 = vector.load %arg2[%c0, %c0_0, %c0_1] : memref<1x4x256xf32, #tpu.memory_space<vmem>>, vector<1x4x256xf32>
    %1 = arith.mulf %0, %0 : vector<1x4x256xf32>
    %cst = arith.constant dense<0.000000e+00> : vector<1x256xf32>
    %2 = vector.multi_reduction <add>, %1, %cst [1] : vector<1x4x256xf32> to vector<1x256xf32>
    %3 = vector.shape_cast %2 : vector<1x256xf32> to vector<1x1x256xf32>
    %4 = math.rsqrt %3 : vector<1x1x256xf32>
    %cst_2 = arith.constant 9.99999995E+11 : f32
    %5 = vector.broadcast %cst_2 : f32 to vector<1x1x256xf32>
    %6 = arith.minimumf %4, %5 : vector<1x1x256xf32>
    %7 = vector.broadcast %6 : vector<1x1x256xf32> to vector<1x4x256xf32>
    %8 = arith.mulf %0, %7 : vector<1x4x256xf32>
    %c0_3 = arith.constant 0 : index
    %c0_4 = arith.constant 0 : index
    %c0_5 = arith.constant 0 : index
    %9 = vector.load %arg3[%c0_3, %c0_4, %c0_5] : memref<1x4x256xf32, #tpu.memory_space<vmem>>, vector<1x4x256xf32>
    tpu.vector_store %arg3[%c0_3, %c0_4, %c0_5], %8 {strides = array<i32>} : memref<1x4x256xf32, #tpu.memory_space<vmem>>, vector<1x4x256xf32>,
    return
  }
  func.func @transform_0(%arg0: i32, %arg1: i32) -> (i32, i32, i32) {
    %c0_i32 = arith.constant 0 : i32
    %c0_i32_0 = arith.constant 0 : i32
    return %arg0, %c0_i32, %arg1 : i32, i32, i32
  }
  func.func @transform_1(%arg0: i32, %arg1: i32) -> (i32, i32, i32) {
    %c0_i32 = arith.constant 0 : i32
    %c0_i32_0 = arith.constant 0 : i32
    return %arg0, %c0_i32, %arg1 : i32, i32, i32
  }
}

</mosaic_0001>

<bundles_post_ra>
// kernel: l2norm.1
= control target key start
LH: loop header
LB: loop body
LE: loop exit
PB: predicated region body
PF: predicated region fallthrough
CT: control target
= control target key end

     0   :  { %s348_s6 = smov 0   ;;  %s350_s7 = smov 0   ;;  %s384_s0 = inlined_call_operand.vmem [shape: f32[2,4,256], index: 0, kind: input, shape index: {}]   ;;  %s385_s1 = inlined_call_operand.vmem [shape: f32[2,4,256], index: 1, kind: output, shape index: {}]  }
   0x1   :  { %s352_s8 = smov 0  }
   0x2 LB: > { %s23_s9 = sadd.s32 1, %s332_s7  ;;  %p277_p0 = scmp.ge.s32.totalorder %s336_s8, 1  ;;  %s336_s8 = sphi %s352_s8, %s11_s8   ;;  %s332_s7 = sphi %s350_s7, %s387_s7   ;;  %s328_s6 = sphi %s348_s6, %s386_s6  }
   0x3   : > { %p25_p1 = scmp.ge.s32.totalorder %s23_s9, 2  ;;  %p108_p2 = scmp.lt.s32.totalorder %s336_s8, 3 }
   0x5   : > { %s389_s9 = smov (%p25_p1, %s23_s9), 0  ;;  %p109_p3 = pnand %p277_p0, %p108_p2 }
   0x6   : > { %p137_p4 = scmp.lt.s32.totalorder (!%p109_p3), %s328_s6, 1 }
   0x7   : > { %112 = sbr.rel (%p109_p3) target bundleno = 54 (0x36), region = 24 }
   0xc   : > { %s391_s6 = smov (!%p137_p4, %s328_s6), 1  ;;  %vm161_vm0 = vcmask 1043456  }
   0xd   : > { %s284_s10 = sshll.u32 %s391_s6, 3 }
   0xe   : > { %s144_s13 = scalar_lea.vmem %s384_s0, %s284_s10  ;;  %s154_s16 = scalar_lea.vmem %s385_s1, %s284_s10 }
   0xf   : > { %v156_v0 = vld [vmem:[%s144_s13] sm:$0xff] }
  0x10   : > { %v157_v1 = vmul.f32 %v156_v0, %v156_v0 }
  0x12   : > { %v159_v2 = vcombine.high %v157_v1, %v157_v1  ;;  %v162_v3 = vsel %vm161_vm0, %v157_v1, 0.0 }
  0x13   : > { %v163_v4 = vrot.slane %v162_v3, 4 }
  0x14   : > { %v169_v5 = vsel %vm161_vm0, %v159_v2, 0.0 }
  0x15   : > { %v164_v6 = vadd.f32 %v163_v4, %v162_v3  ;;  %v170_v7 = vrot.slane %v169_v5, 4 }
  0x17   : > { %v165_v8 = vrot.slane %v164_v6, 2  ;;  %v171_v9 = vadd.f32 %v170_v7, %v169_v5 }
  0x19   : > { %v166_v10 = vadd.f32 %v165_v8, %v164_v6  ;;  %v172_v11 = vrot.slane %v171_v9, 2 }
  0x1b   : > { %v167_v12 = vrot.slane %v166_v10, 1  ;;  %v173_v13 = vadd.f32 %v172_v11, %v171_v9 }
  0x1d   : > { %v168_v14 = vadd.f32 %v167_v12, %v166_v10  ;;  %v174_v15 = vrot.slane %v173_v13, 1 }
  0x1f   : > { %v175_v16 = vadd.f32 %v174_v15, %v173_v13  ;;  %310 = vrsqrt.f32 %v168_v14 }
  0x21   : > { %312 = vrsqrt.f32 %v175_v16 }
  0x2c   : > { %v311_v17 = vpop.eup %310 }
  0x2d   : > { %v178_v18 = vmin.f32 %v311_v17, 1e+12 }
  0x2e   : > { %v313_v19 = vpop.eup %312 }
  0x2f   : > { %v179_v20 = vmin.f32 %v313_v19, 1e+12 }
  0x31   : > { %v182_v21 = vcombine.low %v178_v18, %v179_v20 }
  0x33   : > { %v184_v22 = vmul.f32 %v182_v21, %v156_v0 }
  0x35   : > { %185 = vst [vmem:[%s154_s16] sm:$0xff] %v184_v22 }
  0x36 PF: > { %s11_s8 = sadd.s32 1, %s336_s8   ;;  %s386_s6 = smov %s332_s7 }
  0x37   : > { %p8_p5 = scmp.ge.s32.totalorder %s11_s8, 4   ;;  %s387_s7 = smov %s389_s9 }
  0x39   :  { %10 = sbr.rel (!%p8_p5) target bundleno = 2 (0x2), region = 54 }

</bundles_post_ra>
